<compile_context>
chip_gen: v5e
topology: v5e:2x2
jax: 0.10.0
libtpu: 0.0.40
codegen_flags: <defaults>
</compile_context>

<pallas_src>
import functools

import jax
import jax.numpy as jnp
from jax.experimental import pallas as pl
from jax.experimental.pallas import tpu as pltpu


_VMEM_BUDGET_BYTES = 12 * 1024 * 1024   # total streamed working set (double-buffered)
_COMPILER_PARAMS = pltpu.CompilerParams(
    dimension_semantics=("parallel",),          # rows are independent -> megacore
    vmem_limit_bytes=32 * 1024 * 1024,          # safe on v5e/v6e (128 MiB) and v7x (64 MiB)
)


def _round_up(x, m):
    return ((x + m - 1) // m) * m


def _choose_row_tile(n_rows, d, itemsize, n_streams):
    """Largest row tile whose double-buffered streams fit the VMEM budget,
    preferring >= 2 grid steps so v7x can split rows across its 2 TensorCores."""
    sub = 8 * max(1, 4 // int(itemsize))                  # 8 for f32, 16 for bf16
    per_tile = _VMEM_BUDGET_BYTES // (2 * n_streams)      # 2 == double buffering
    max_rows = max(sub, (per_tile // max(1, d * int(itemsize))) // sub * sub)
    half = max(sub, _round_up(pl.cdiv(max(n_rows, 1), 2), sub))
    full = _round_up(max(n_rows, 1), sub)
    return int(min(max_rows, half, full))


def _flatten_pad(x, row_tile):
    d = x.shape[-1]
    x2d = x.reshape(-1, d)
    r = x2d.shape[0]
    rp = _round_up(r, row_tile)
    if rp != r:
        x2d = jnp.pad(x2d, ((0, rp - r), (0, 0)))
    return x2d, r, rp


# --------------------------------------------------------------------------
# Kernel 1: LayerNorm (pre-norm), exact PyTorch-reference numerics.
# --------------------------------------------------------------------------
def _layernorm_kernel(x_ref, a_ref, b_ref, o_ref, *, eps, d_model):
    x = x_ref[...].astype(jnp.float32)                              # (R, D)
    mean = jnp.mean(x, axis=-1, keepdims=True)                      # (R, 1)
    diff = x - mean
    # torch.Tensor.std is unbiased (divide by D - 1); eps is added to std.
    var_unbiased = jnp.sum(diff * diff, axis=-1, keepdims=True) / (d_model - 1)
    std = jnp.sqrt(var_unbiased)
    inv = pl.reciprocal(std + eps, approx=False)
    y = a_ref[...] * diff * inv + b_ref[...]
    o_ref[...] = y.astype(o_ref.dtype)


def pallas_layernorm(x, a_2, b_2, *, eps=1e-6):
    """LayerNorm over the last dim of x (any leading shape), preserving dtype."""
    orig_shape = x.shape
    d = orig_shape[-1]
    row_tile = _choose_row_tile(x.size // d, d, x.dtype.itemsize, n_streams=2)
    x2d, r, rp = _flatten_pad(x, row_tile)
    a2 = a_2.reshape(1, d).astype(jnp.float32)
    b2 = b_2.reshape(1, d).astype(jnp.float32)

    kernel = functools.partial(_layernorm_kernel, eps=float(eps), d_model=d)
    out = pl.pallas_call(
        kernel,
        out_shape=jax.ShapeDtypeStruct((rp, d), x2d.dtype),
        grid_spec=pltpu.PrefetchScalarGridSpec(
            num_scalar_prefetch=0,
            grid=(rp // row_tile,),
            in_specs=[
                pl.BlockSpec((row_tile, d), lambda i: (i, 0)),
                pl.BlockSpec((1, d), lambda i: (0, 0)),
                pl.BlockSpec((1, d), lambda i: (0, 0)),
            ],
            out_specs=pl.BlockSpec((row_tile, d), lambda i: (i, 0)),
        ),
        compiler_params=_COMPILER_PARAMS,
    )(x2d, a2, b2)
    return out[:r].reshape(orig_shape)


# --------------------------------------------------------------------------
# Kernel 2: residual add (eval path: nn.Dropout is the identity).
# --------------------------------------------------------------------------
def _residual_add_kernel(x_ref, y_ref, o_ref):
    o_ref[...] = (x_ref[...].astype(jnp.float32)
                  + y_ref[...].astype(jnp.float32)).astype(o_ref.dtype)


def pallas_residual_add(x, y):
    orig_shape = x.shape
    d = orig_shape[-1]
    row_tile = _choose_row_tile(x.size // d, d, x.dtype.itemsize, n_streams=3)
    x2d, r, rp = _flatten_pad(x, row_tile)
    y2d, _, _ = _flatten_pad(y, row_tile)
    out = pl.pallas_call(
        _residual_add_kernel,
        out_shape=jax.ShapeDtypeStruct((rp, d), x2d.dtype),
        grid_spec=pltpu.PrefetchScalarGridSpec(
            num_scalar_prefetch=0,
            grid=(rp // row_tile,),
            in_specs=[
                pl.BlockSpec((row_tile, d), lambda i: (i, 0)),
                pl.BlockSpec((row_tile, d), lambda i: (i, 0)),
            ],
            out_specs=pl.BlockSpec((row_tile, d), lambda i: (i, 0)),
        ),
        compiler_params=_COMPILER_PARAMS,
    )(x2d, y2d)
    return out[:r].reshape(orig_shape)


# --------------------------------------------------------------------------
# Kernel 2b: residual add + train-mode dropout (inverted scaling), TPU PRNG.
# --------------------------------------------------------------------------
def _residual_dropout_kernel(seed_ref, x_ref, y_ref, o_ref, *, rate):
    pltpu.prng_seed(seed_ref[0] + pl.program_id(0))
    bits = pltpu.bitcast(pltpu.prng_random_bits(o_ref.shape), jnp.uint32)
    thr = jnp.uint32(min(int(rate * 4294967296.0), 4294967295))
    keep = bits >= thr
    scale = jnp.float32(1.0 / (1.0 - rate))
    y = jnp.where(keep, y_ref[...].astype(jnp.float32) * scale, jnp.float32(0.0))
    o_ref[...] = (x_ref[...].astype(jnp.float32) + y).astype(o_ref.dtype)


def pallas_residual_dropout(x, y, *, rate, seed=0):
    if rate <= 0.0:
        return pallas_residual_add(x, y)
    orig_shape = x.shape
    d = orig_shape[-1]
    row_tile = _choose_row_tile(x.size // d, d, x.dtype.itemsize, n_streams=3)
    x2d, r, rp = _flatten_pad(x, row_tile)
    y2d, _, _ = _flatten_pad(y, row_tile)
    seed_arr = jnp.asarray([seed], dtype=jnp.int32)
    kernel = functools.partial(_residual_dropout_kernel, rate=float(rate))
    out = pl.pallas_call(
        kernel,
        out_shape=jax.ShapeDtypeStruct((rp, d), x2d.dtype),
        grid_spec=pltpu.PrefetchScalarGridSpec(
            num_scalar_prefetch=1,
            grid=(rp // row_tile,),
            in_specs=[
                pl.BlockSpec((row_tile, d), lambda i, seed_ref: (i, 0)),
                pl.BlockSpec((row_tile, d), lambda i, seed_ref: (i, 0)),
            ],
            out_specs=pl.BlockSpec((row_tile, d), lambda i, seed_ref: (i, 0)),
        ),
        compiler_params=_COMPILER_PARAMS,
    )(seed_arr, x2d, y2d)
    return out[:r].reshape(orig_shape)


# --------------------------------------------------------------------------
# Module mirror.
# --------------------------------------------------------------------------
class PallasSublayerConnection:
    """out = x + dropout(sublayer(LayerNorm(x)))  (norm-first residual)."""

    def __init__(self, size, dropout, eps=1e-6):
        self.size = size
        self.dropout_rate = float(dropout)
        self.eps = eps
        # nn.Parameter(torch.ones(size)) / nn.Parameter(torch.zeros(size))
        self.a_2 = jnp.ones((size,), dtype=jnp.float32)
        self.b_2 = jnp.zeros((size,), dtype=jnp.float32)

    def __call__(self, x, sublayer, *, training=False, dropout_seed=0):
        normed = pallas_layernorm(x, self.a_2, self.b_2, eps=self.eps)
        # TODO(synk): `sublayer` is an arbitrary user callable (not defined in
        # the module source); it is applied as a JAX-level function here.
        y = sublayer(normed)
        if training and self.dropout_rate > 0.0:
            return pallas_residual_dropout(x, y, rate=self.dropout_rate,
                                           seed=dropout_seed)
        return pallas_residual_add(x, y)   # eval: nn.Dropout == identity


# --------------------------------------------------------------------------
# Pure-JAX reference (eval mode: dropout is identity).
# --------------------------------------------------------------------------
def _reference_sublayer_connection(x, a_2, b_2, sublayer, eps=1e-6):
    mean = jnp.mean(x, axis=-1, keepdims=True)
    diff = x - mean
    d = x.shape[-1]
    std = jnp.sqrt(jnp.sum(diff * diff, axis=-1, keepdims=True) / (d - 1))
    normed = a_2 * diff / (std + eps) + b_2
    return x + sublayer(normed)


if __name__ == "__main__":
    key = jax.random.PRNGKey(0)
    B, S, D = 2, 8, 32                       # batch, seq, size (d_model)
    kx, kw = jax.random.split(key)
    x = jax.random.normal(kx, (B, S, D), dtype=jnp.float32)
    w = jax.random.normal(kw, (D, D), dtype=jnp.float32) / jnp.sqrt(D)
    sublayer = lambda t: jnp.tanh(t @ w)     # any size-preserving sublayer

    block = PallasSublayerConnection(size=D, dropout=0.1)

    # Eval-mode forward (dropout identity), f32.
    out = jax.block_until_ready(block(x, sublayer))
    ref = _reference_sublayer_connection(x, block.a_2, block.b_2, sublayer)
    assert out.shape == (B, S, D)
    assert jnp.allclose(out, ref, atol=1e-5, rtol=1e-5), "f32 mismatch vs reference"

    # Ragged row count (3*5 = 15 rows) exercises the pad-to-tile path.
    x2 = jax.random.normal(jax.random.PRNGKey(1), (3, 5, D), dtype=jnp.float32)
    out2 = jax.block_until_ready(block(x2, sublayer))
    ref2 = _reference_sublayer_connection(x2, block.a_2, block.b_2, sublayer)
    assert jnp.allclose(out2, ref2, atol=1e-5, rtol=1e-5), "ragged mismatch vs reference"

    # bf16 I/O smoke test (kernels compute in f32, store bf16 -> half HBM traffic).
    xb = x.astype(jnp.bfloat16)
    outb = jax.block_until_ready(
        block(xb, lambda t: jnp.tanh(t @ w.astype(jnp.bfloat16))))
    assert outb.dtype == jnp.bfloat16 and outb.shape == (B, S, D)
    assert bool(jnp.all(jnp.isfinite(outb.astype(jnp.float32))))

    print("KERNEL_OK")
</pallas_src>

<mosaic_0001>
module attributes {stable_mosaic.version = 11 : i64} {
  func.func @_layernorm_kernel(%arg0: i32, %arg1: memref<8x32xf32, #tpu.memory_space<vmem>>, %arg2: memref<1x32xf32, #tpu.memory_space<vmem>>, %arg3: memref<1x32xf32, #tpu.memory_space<vmem>>, %arg4: memref<8x32xf32, #tpu.memory_space<vmem>>) attributes {dimension_semantics = [#tpu.dimension_semantics<parallel>], iteration_bounds = array<i64: 2>, scalar_prefetch = 0 : i64, scratch_operands = 0 : i64, tpu.core_type = #tpu.core_type<tc>, window_params = [{transform_indices = @transform_0, window_bounds = array<i64: 8, 32>}, {pipeline_mode = #tpu.pipeline_mode<synchronous>, transform_indices = @transform_1, window_bounds = array<i64: 1, 32>}, {pipeline_mode = #tpu.pipeline_mode<synchronous>, transform_indices = @transform_2, window_bounds = array<i64: 1, 32>}, {transform_indices = @transform_3, window_bounds = array<i64: 8, 32>}]} {
    %c0 = arith.constant 0 : index
    %c0_0 = arith.constant 0 : index
    %0 = vector.load %arg1[%c0, %c0_0] : memref<8x32xf32, #tpu.memory_space<vmem>>, vector<8x32xf32>
    %cst = arith.constant dense<0.000000e+00> : vector<8xf32>
    %1 = vector.multi_reduction <add>, %0, %cst [1] : vector<8x32xf32> to vector<8xf32>
    %2 = vector.shape_cast %1 : vector<8xf32> to vector<8x1xf32>
    %cst_1 = arith.constant 3.200000e+01 : f32
    %3 = vector.broadcast %cst_1 : f32 to vector<8x1xf32>
    %4 = arith.divf %2, %3 : vector<8x1xf32>
    %5 = vector.broadcast %4 : vector<8x1xf32> to vector<8x32xf32>
    %6 = arith.subf %0, %5 : vector<8x32xf32>
    %7 = arith.mulf %6, %6 : vector<8x32xf32>
    %cst_2 = arith.constant dense<0.000000e+00> : vector<8xf32>
    %8 = vector.multi_reduction <add>, %7, %cst_2 [1] : vector<8x32xf32> to vector<8xf32>
    %9 = vector.shape_cast %8 : vector<8xf32> to vector<8x1xf32>
    %cst_3 = arith.constant 3.100000e+01 : f32
    %10 = vector.broadcast %cst_3 : f32 to vector<8x1xf32>
    %11 = arith.divf %9, %10 : vector<8x1xf32>
    %12 = math.sqrt %11 : vector<8x1xf32>
    %cst_4 = arith.constant 9.99999997E-7 : f32
    %13 = vector.broadcast %cst_4 : f32 to vector<8x1xf32>
    %14 = arith.addf %12, %13 : vector<8x1xf32>
    %15 = tpu.reciprocal %14 : vector<8x1xf32> -> vector<8x1xf32>
    %c0_5 = arith.constant 0 : index
    %c0_6 = arith.constant 0 : index
    %16 = vector.load %arg2[%c0_5, %c0_6] : memref<1x32xf32, #tpu.memory_space<vmem>>, vector<1x32xf32>
    %17 = vector.broadcast %16 : vector<1x32xf32> to vector<8x32xf32>
    %18 = arith.mulf %17, %6 : vector<8x32xf32>
    %19 = vector.broadcast %15 : vector<8x1xf32> to vector<8x32xf32>
    %20 = arith.mulf %18, %19 : vector<8x32xf32>
    %c0_7 = arith.constant 0 : index
    %c0_8 = arith.constant 0 : index
    %21 = vector.load %arg3[%c0_7, %c0_8] : memref<1x32xf32, #tpu.memory_space<vmem>>, vector<1x32xf32>
    %22 = vector.broadcast %21 : vector<1x32xf32> to vector<8x32xf32>
    %23 = arith.addf %20, %22 : vector<8x32xf32>
    %c0_9 = arith.constant 0 : index
    %c0_10 = arith.constant 0 : index
    %24 = vector.load %arg4[%c0_9, %c0_10] : memref<8x32xf32, #tpu.memory_space<vmem>>, vector<8x32xf32>
    tpu.vector_store %arg4[%c0_9, %c0_10], %23 {strides = array<i32>} : memref<8x32xf32, #tpu.memory_space<vmem>>, vector<8x32xf32>,
    return
  }
  func.func @transform_0(%arg0: i32) -> (i32, i32) {
    %c0_i32 = arith.constant 0 : i32
    %c0_i32_0 = arith.constant 0 : i32
    return %arg0, %c0_i32 : i32, i32
  }
  func.func @transform_1(%arg0: i32) -> (i32, i32) {
    %c0_i32 = arith.constant 0 : i32
    %c0_i32_0 = arith.constant 0 : i32
    %c0_i32_1 = arith.constant 0 : i32
    return %c0_i32, %c0_i32_0 : i32, i32
  }
  func.func @transform_2(%arg0: i32) -> (i32, i32) {
    %c0_i32 = arith.constant 0 : i32
    %c0_i32_0 = arith.constant 0 : i32
    %c0_i32_1 = arith.constant 0 : i32
    return %c0_i32, %c0_i32_0 : i32, i32
  }
  func.func @transform_3(%arg0: i32) -> (i32, i32) {
    %c0_i32 = arith.constant 0 : i32
    %c0_i32_0 = arith.constant 0 : i32
    return %arg0, %c0_i32 : i32, i32
  }
}

</mosaic_0001>

<bundles_post_ra>
// kernel: tpu_custom_call.1
= control target key start
LH: loop header
LB: loop body
LE: loop exit
PB: predicated region body
PF: predicated region fallthrough
CT: control target
= control target key end

     0   :  { %8 = vsyncpa [#allocation3], 0  ;;  %s750_s0 = inlined_call_operand.hbm [shape: f32[16,32], index: 0, kind: input, shape index: {}]   ;;  %s751_s1 = inlined_call_operand.hbm [shape: f32[1,32], index: 1, kind: input, shape index: {}]   ;;  %s752_s2 = inlined_call_operand.vmem [shape: f32[1,32], index: 2, kind: input, shape index: {}]   ;;  %s753_s3 = inlined_call_operand.hbm [shape: f32[16,32], index: 3, kind: output, shape index: {}]  }
   0x1   :  { %10 = vsyncpa [#allocation3 + $0x1], 0 }
   0x2   :  { %11 = vsyncpa [#allocation6], 0 }
   0x3   :  { %12 = vsyncpa [#allocation4], 0 }
   0x4   :  { %14 = vsyncpa [#allocation4 + $0x1], 0  ;;  %s602_s12 = smov 0   ;;  %s604_s13 = smov 0  }
   0x5   :  { %s606_s14 = smov 0   ;;  %s608_s15 = smov 0  }
   0x6 LB: > { %s623_s16 = sadd.s32 4294967295, %s577_s15   ;;  %s364_s17 = sadd.s32 4294967294, %s577_s15   ;;  %s577_s15 = sphi %s608_s15, %s763_s15   ;;  %s573_s14 = sphi %s606_s14, %s762_s14   ;;  %s569_s13 = sphi %s604_s13, %s761_s13   ;;  %s565_s12 = sphi %s602_s12, %s760_s12  }
   0x7   : > { %p40_p0 = scmp.ne.s32.totalorder %s569_s13, %s565_s12  ;;  %p41_p1 = scmp.eq.s32.totalorder %s623_s16, 0 }
   0x8   : > { %p106_p2 = scmp.eq.s32.totalorder %s623_s16, 1  ;;  %p112_p3 = scmp.eq.s32.totalorder %s364_s17, 1 }
   0x9   : > { %p632_p4 = por %p41_p1, %p40_p0  ;;  %p365_p5 = scmp.ge.s32.totalorder %s577_s15, 1 }
   0xa   : > { %p637_p6 = por %p112_p3, %p40_p0  ;;  %p119_p7 = scmp.lt.s32.totalorder %s577_s15, 3 }
   0xb   : > { %s131_s22 = sshll.u32 %s751_s1, 4  ;;  %s579_s24 = smov [#allocation5]   ;;  %s132_s22 = int_to_ptr.hbm [resolvable:$true] %s131_s22 }
   0xc   : > { %p645_p8 = pnand %p365_p5, %p119_p7  ;;  %s133_s25 = sshll.u32 %s579_s24, 4  ;;  %s134_s25 = int_to_ptr.vmem [resolvable:$true] %s133_s25 }
   0xd   : > { %s655_s26 = sadd.s32 1, %s577_s15   ;;  %s27_s27 = sadd.s32 1, %s573_s14 }
   0xe   : > { %p386_p10 = pneg %p645_p8  ;;  %s24_s28 = ssub.s32 %s577_s15, %s655_s26 }
   0xf   : > { %p25_p12 = scmp.eq.s32.totalorder %s24_s28, 0  ;;  %p34_p13 = scmp.ne.s32.totalorder %s573_s14, %s569_s13 }
  0x10   : > { %p387_p11 = pnand %p386_p10, %p41_p1  ;;  %p35_p0 = scmp.eq.s32.totalorder %s577_s15, 0 }
  0x11   : > { %s664_s29 = scalar_select %p25_p12, %s573_s14, %s27_s27  }
  0x12   : > { %389 = dma.hbm_to_vmem [thread:$0]  (!%p387_p11), %s132_s22, 16, %s134_s25, [#allocation6]  }
  0x13   : > { %p668_p3 = por %p106_p2, %p34_p13  ;;  %p399_p5 = scmp.lt.s32.totalorder %s577_s15, 2 }
  0x14   : > { %s147_s4 = sand.u32 1, %s573_s14   ;;  %s369_s5 = sshll.u32 %s577_s15, 3 }
  0x15   : > { %p36_p7 = por %p35_p0, %p34_p13  ;;  %s368_s6 = sshll.u32 %s147_s4, 3 }
  0x16   : > { %s155_s9 = scalar_lea.hbm %s750_s0, %s369_s5  ;;  %s151_s11 = scalar_lea.vmem [#allocation2], %s368_s6 }
  0x17   : > { %s157_s10 = sshll.u32 %s155_s9, 4  ;;  %s159_s17 = sshll.u32 %s151_s11, 4  ;;  %s158_s10 = int_to_ptr.hbm [resolvable:$true] %s157_s10  ;;  %s160_s17 = int_to_ptr.vmem [resolvable:$true] %s159_s17 }
  0x18   : > { %p678_p10 = pnand %p399_p5, %p36_p7  ;;  %s148_s21 = scalar_lea.sflag [#allocation3], %s147_s4 }
  0x19   : > { %s477_s22 = sshra.s32 %s158_s10, 4  ;;  %s484_s28 = scalar_lea.hbm %s750_s0, 16  ;;  %s478_s22 = int_to_ptr.hbm [resolvable:$true] %s477_s22 }
  0x1a   : > { %s479_s24 = scalar_lea.hbm %s478_s22, 8  ;;  %p481_p11 = pneg %p678_p10 }
  0x1b   : > { %p480_p2 = scmp.ne.s32.totalorder %s478_s22, %s479_s24  ;;  %p485_p0 = scmp.lt.s32.totalorder %s478_s22, %s750_s0 }
  0x1c   : > { %p486_p5 = scmp.lt.s32.totalorder %s484_s28, %s479_s24 }
  0x1d   : > { %p482_p12 = pnand %p481_p11, %p480_p2 }
  0x1e   : > { %p487_p7 = por %p486_p5, %p485_p0 }
  0x1f   : > { %p483_p13 = pneg %p482_p12 }
  0x21   : > { %p488_p9 = pnand %p487_p7, %p483_p13 }
  0x23   : > { %491 = shalt.err (!%p488_p9)
}
  0x24   : > { %393 = dma.hbm_to_vmem [thread:$0]  (!%p678_p10), %s158_s10, 128, %s160_s17, %s148_s21  }
  0x25   : > { %168 = sbr.rel (%p645_p8) target bundleno = 335 (0x14f), region = 32  ;;  %s695_s4 = sand.u32 (!%p645_p8), 1, %s569_s13  }
  0x26   : > { %s371_s7 = sshll.u32 (!%p645_p8), %s695_s4, 3  ;;  %s171_s8 = scalar_lea.sflag (!%p645_p8), [#allocation3], %s695_s4 }
  0x27   : > { %s174_s9 = scalar_lea.vmem (!%p645_p8), [#allocation2], %s371_s7 }
  0x2a   : > { %552 = dma.done.wait (%p632_p4), %s171_s8, 128  }
  0x2b   : > { %554 = vsyncadd (%p632_p4), %s171_s8, 4294967168 }
  0x2c   : > { %556 = dma.done.wait (%p41_p1), [#allocation6], 16  }
  0x2d   : > { %558 = vsyncadd (%p41_p1), [#allocation6], 4294967280  ;;  %vm204_vm0 = vcmask 261120   ;;  %v203_v0 = vld [vmem:[%s174_s9] sm:$0xff]  ;;  %v580_v2 = vmov 32.0   ;;  %v581_v14 = vmov 31.0  }
  0x2e   : > { %v205_v1 = vsel %vm204_vm0, %v203_v0, 0.0  ;;  %439 = vrcp.f32 %v580_v2  ;;  %s375_s18 = sshll.u32 %s623_s16, 3  ;;  %v437_v38 = vld [vmem:[#allocation5] ss:$0 sm:$0xff]  ;;  %v438_v45 = vld [vmem:[%s752_s2] ss:$0 sm:$0xff] }
  0x2f   : > { %206 = vadd.xlane.f32.xlu0 %v205_v1  ;;  %441 = vrcp.f32 %v581_v14  ;;  %s279_s11 = scalar_lea.hbm %s753_s3, %s375_s18  ;;  %s202_s16 = scalar_lea.vmem [#allocation7], %s371_s7 }
  0x30   : > { %s281_s21 = sshll.u32 %s202_s16, 4  ;;  %s283_s22 = sshll.u32 %s279_s11, 4  ;;  %s282_s21 = int_to_ptr.vmem [resolvable:$true] %s281_s21  ;;  %s284_s22 = int_to_ptr.hbm [resolvable:$true] %s283_s22 }
  0x31   : > { %s269_s24 = scalar_lea.sflag [#allocation4], %s695_s4  ;;  %s521_s25 = sshra.s32 %s284_s22, 4  ;;  %s522_s25 = int_to_ptr.hbm [resolvable:$true] %s521_s25 }
  0x32   : > { %s523_s27 = scalar_lea.hbm %s522_s25, 8  ;;  %s527_s6 = scalar_lea.hbm %s753_s3, 16 }
  0x33   : > { %p524_p1 = scmp.ne.s32.totalorder %s522_s25, %s523_s27  ;;  %p528_p9 = scmp.lt.s32.totalorder %s522_s25, %s753_s3 }
  0x34   : > { %v440_v3 = vpop.eup %439  ;;  %p529_p10 = scmp.lt.s32.totalorder %s527_s6, %s523_s27 }
  0x35   : > { %v209_v4 = vmul.f32 32.0, %v440_v3  ;;  %vm213_vm1 = vweird.f32 %v440_v3  ;;  %v442_v15 = vpop.eup %441  ;;  %p525_p4 = pnand %p524_p1, %p668_p3 }
  0x36   : > { %v222_v16 = vmul.f32 31.0, %v442_v15  ;;  %vm226_vm2 = vweird.f32 %v442_v15  ;;  %p530_p2 = por %p529_p10, %p528_p9 }
  0x37   : > { %v210_v5 = vsub.f32 1.0, %v209_v4  ;;  %p526_p8 = pneg %p525_p4 }
  0x38   : > { %v223_v17 = vsub.f32 1.0, %v222_v16 }
  0x39   : > { %v211_v6 = vmul.f32 %v440_v3, %v210_v5  ;;  %p531_p11 = pnand %p530_p2, %p526_p8 }
  0x3a   : > { %v224_v18 = vmul.f32 %v442_v15, %v223_v17 }
  0x3b   : > { %v212_v7 = vadd.f32 %v440_v3, %v211_v6 }
  0x3c   : > { %v225_v19 = vadd.f32 %v442_v15, %v224_v18 }
  0x3d   : > { %v214_v8 = vsel %vm213_vm1, %v440_v3, %v212_v7 }
  0x3e   : > { %v227_v20 = vsel %vm226_vm2, %v442_v15, %v225_v19 }
  0xa2   : > { %v207_v9 = vpop.xlane.xlu0 %206 }
  0xa3   : > { %v215_v10 = vmul.f32 %v214_v8, %v207_v9 }
  0xa5   : > { %v216_v11 = vsub.f32 %v203_v0, %v215_v10 }
  0xa7   : > { %v217_v12 = vmul.f32 %v216_v11, %v216_v11  ;;  %v260_v43 = vmul.f32 %v437_v38, %v216_v11 }
  0xa9   : > { %v218_v13 = vsel %vm204_vm0, %v217_v12, 0.0 }
  0xaa   : > { %219 = vadd.xlane.f32.xlu0 %v218_v13 }
 0x11d   : > { %v220_v21 = vpop.xlane.xlu0 %219 }
 0x11e   : > { %v228_v22 = vmul.f32 %v227_v20, %v220_v21 }
 0x120   : > { %443 = vrsqrt.f32 %v228_v22  ;;  %vm236_vm3 = vcmp.eq.f32.partialorder %v228_v22, inf  ;;  %v239_v30 = vand.u32 2147483648, %v228_v22  ;;  %vm238_vm4 = vcmp.eq.f32.partialorder %v228_v22, 0.0 }
 0x126   : > { %v444_v23 = vpop.eup %443 }
 0x127   : > { %v230_v24 = vmul.f32 %v444_v23, %v228_v22 }
 0x129   : > { %v231_v25 = vmul.f32 %v444_v23, %v230_v24 }
 0x12b   : > { %v232_v26 = vmul.f32 0.5, %v231_v25 }
 0x12d   : > { %v233_v27 = vsub.f32 1.5, %v232_v26 }
 0x12f   : > { %v234_v28 = vmul.f32 %v444_v23, %v233_v27 }
 0x131   : > { %v235_v29 = vmul.f32 %v234_v28, %v228_v22 }
 0x133   : > { %v237_v31 = vsel %vm236_vm3, %v228_v22, %v235_v29 }
 0x134   : > { %v240_v32 = vsel %vm238_vm4, %v239_v30, %v237_v31 }
 0x135   : > { %v241_v33 = vadd.f32 1e-06, %v240_v32 }
 0x137   : > { %445 = vrcp.f32 %v241_v33  ;;  %v253_v37 = vand.u32 2147483648, %v241_v33  ;;  %v251_v40 = vand.u32 2147483647, %v241_v33  ;;  %vm247_vm6 = vweird.f32 %v241_v33 }
 0x139   : > { %v254_v42 = vor.u32 1.1754944e-38, %v253_v37  ;;  %vm252_vm8 = vcmp.eq.f32.partialorder %v251_v40, 8.507059e+37 }
 0x13d   : > { %v446_v34 = vpop.eup %445 }
 0x13e   : > { %v243_v35 = vmul.f32 %v446_v34, %v241_v33  ;;  %vm248_vm5 = vweird.f32 %v446_v34 }
 0x13f   : > { %vm249_vm7 = vmor %vm247_vm6, %vm248_vm5 }
 0x140   : > { %v244_v36 = vsub.f32 1.0, %v243_v35 }
 0x142   : > { %v245_v39 = vmul.f32 %v446_v34, %v244_v36 }
 0x144   : > { %v246_v41 = vadd.f32 %v446_v34, %v245_v39 }
 0x146   : > { %v250_v44 = vsel %vm249_vm7, %v446_v34, %v246_v41 }
 0x147   : > { %v255_v46 = vsel %vm252_vm8, %v254_v42, %v250_v44 }
 0x148   : > { %v261_v47 = vmul.f32 %v260_v43, %v255_v46 }
 0x14a   : > { %v266_v48 = vadd.f32 %v438_v45, %v261_v47 }
 0x14c   : > { %267 = vst.msk [vmem:[%s202_s16] sm:$0xff] %vm204_vm0, %v266_v48 }
 0x14d   : > { %534 = shalt.err (!%p531_p11)
}
 0x14e   : > { %384 = dma.vmem_to_hbm [thread:$0]  (%p668_p3), %s282_s21, 128, %s284_s22, %s269_s24  }
 0x14f PF: > { %s295_s4 = sand.u32 1, %s565_s12   ;;  %p759_p12 = scmp.ge.s32.totalorder %s577_s15, 2 }
 0x150   : > { %s296_s9 = scalar_lea.sflag [#allocation4], %s295_s4 }
 0x151   : > { %p395_p13 = pnand %p759_p12, %p637_p6 }
 0x153   : > { %p396_p0 = pneg %p395_p13 }
 0x155   : > { %560 = dma.done.wait (%p396_p0), %s296_s9, 128  }
 0x156   : > { %562 = vsyncadd (%p396_p0), %s296_s9, 4294967168  ;;  %p17_p5 = scmp.ge.s32.totalorder %s655_s26, 4   ;;  %s760_s12 = smov %s569_s13 }
 0x157   : > { %s761_s13 = smov %s573_s14  ;;  %s762_s14 = smov %s664_s29 }
 0x158   : > { %s763_s15 = smov %s655_s26  ;;  %19 = sbr.rel (!%p17_p5) target bundleno = 6 (0x6), region = 81 }
 0x15d   :  { %302 = vsyncpa [#allocation3], 1 }
 0x15e   :  { %304 = vsyncpa [#allocation3 + $0x1], 1 }
 0x15f   :  { %305 = vsyncpa [#allocation6], 1 }
 0x160   :  { %306 = vsyncpa [#allocation4], 1 }
 0x161   :  { %308 = vsyncpa [#allocation4 + $0x1], 1 }

</bundles_post_ra>
